<compile_context>
chip_gen: v7x
topology: tpu7x:2x2x1
jax: 0.10.0
libtpu: 0.0.40
codegen_flags: <defaults>
</compile_context>

<pallas_src>
import math

import jax
import jax.numpy as jnp
from jax.experimental import pallas as pl
from jax.experimental.pallas import tpu as pltpu


# ------------------------- fused forward kernel ---------------------------- #
def _make_fused_kernel(d_k, d_v, mxu_dtype):
    def kernel(xq_ref, xk_ref, xv_ref,
               wq_ref, bq_ref, wk_ref, bk_ref, wv_ref, bv_ref,
               wo_ref, bo_ref, o_ref, acc_ref):
        # Blocks:
        #   xq: (Bb, nq, d_model)     xk, xv: (Bb, nk, d_model)
        #   wq/wk: (d_model, d_k)     wv: (d_model, d_v)    wo: (d_v, d_model)
        #   bq/bk: (1, d_k) f32       bv: (1, d_v) f32      bo: (1, d_model) f32
        #   o_ref: (Bb, nq, d_model)  acc_ref: (Bb*nq, d_model) f32 scratch
        hh = pl.program_id(1)

        @pl.when(hh == 0)
        def _():
            acc_ref[...] = jnp.zeros_like(acc_ref)

        Bb, nq, d_model = xq_ref.shape
        nk = xk_ref.shape[1]

        # Flatten batch for the projection matmuls (more MXU M rows per push).
        xq = xq_ref[...].reshape(Bb * nq, d_model).astype(mxu_dtype)
        xk = xk_ref[...].reshape(Bb * nk, d_model).astype(mxu_dtype)
        xv = xv_ref[...].reshape(Bb * nk, d_model).astype(mxu_dtype)

        # This head's Q/K/V projections, f32 accumulation on the MXU.
        # 1/sqrt(d_k) is pre-folded into wq/bq; cast to MXU dtype exactly once.
        q = (jnp.dot(xq, wq_ref[...], preferred_element_type=jnp.float32)
             + bq_ref[...]).astype(mxu_dtype).reshape(Bb, nq, d_k)
        k = (jnp.dot(xk, wk_ref[...], preferred_element_type=jnp.float32)
             + bk_ref[...]).astype(mxu_dtype).reshape(Bb, nk, d_k)
        v = (jnp.dot(xv, wv_ref[...], preferred_element_type=jnp.float32)
             + bv_ref[...]).astype(mxu_dtype).reshape(Bb, nk, d_v)

        # Scores: contract d_k of both operands (no explicit K transpose).
        s = jnp.einsum('bqd,bkd->bqk', q, k,
                       preferred_element_type=jnp.float32)          # (Bb, nq, nk)

        # Numerically stable softmax, all math in f32 (VPU/EUP).
        s = s - jnp.max(s, axis=-1, keepdims=True)
        p = jnp.exp(s)
        p = p * pl.reciprocal(jnp.sum(p, axis=-1, keepdims=True), approx=True)
        # dropout(p=0.1): eval-mode identity.

        o = jnp.einsum('bqk,bkd->bqd', p.astype(mxu_dtype), v,
                       preferred_element_type=jnp.float32)          # (Bb, nq, d_v)

        # Output projection folded into the head loop as an accumulation.
        acc_ref[...] += jnp.dot(o.reshape(Bb * nq, d_v).astype(mxu_dtype),
                                wo_ref[...],
                                preferred_element_type=jnp.float32)

        @pl.when(hh == pl.num_programs(1) - 1)
        def _():
            y = acc_ref[...] + bo_ref[...]                           # (Bb*nq, d_model)
            o_ref[...] = y.reshape(Bb, nq, d_model).astype(o_ref.dtype)

    return kernel


def _padded_bytes(shape, dtype):
    """Bytes of a VMEM buffer after (8, 128) tile padding of the last two dims."""
    dims = list(shape)
    if len(dims) >= 1:
        dims[-1] = -(-dims[-1] // 128) * 128
    if len(dims) >= 2:
        dims[-2] = -(-dims[-2] // 8) * 8
    n = 1
    for d in dims:
        n *= int(d)
    return n * jnp.dtype(dtype).itemsize


def fused_sdpa(queries, keys, values, params, *, h, d_k, d_v,
               mxu_dtype=jnp.bfloat16, batch_block=None):
    """queries: (b_s, nq, d_model), keys/values: (b_s, nk, d_model)."""
    b_s, nq, d_model = queries.shape
    nk = keys.shape[1]
    wq, bq, wk, bk, wv, bv, wo, bo = params

    # Pick the largest batch block (divisor of b_s) keeping projection M rows modest.
    if batch_block is None:
        batch_block = 1
        for cand in range(1, b_s + 1):
            if b_s % cand == 0 and cand * max(nq, nk) <= 512:
                batch_block = cand
    Bb = batch_block
    assert b_s % Bb == 0, "batch_block must divide b_s"

    io_dtype = queries.dtype

    # Explicit scoped-VMEM budget from the actual block footprint (double-buffered
    # inputs/weights/outputs + scratch + intermediates), clamped to 64 MiB so it
    # is valid on v7x (64 MiB physical) as well as v5e/v6e.
    est = 0
    est += 2 * _padded_bytes((Bb, nq, d_model), io_dtype)            # xq
    est += 2 * 2 * _padded_bytes((Bb, nk, d_model), io_dtype)        # xk, xv
    est += 2 * 2 * _padded_bytes((d_model, d_k), mxu_dtype)          # wq, wk
    est += 2 * _padded_bytes((d_model, d_v), mxu_dtype)              # wv
    est += 2 * _padded_bytes((d_v, d_model), mxu_dtype)              # wo
    est += 2 * 2 * _padded_bytes((1, d_k), jnp.float32)              # bq, bk
    est += 2 * _padded_bytes((1, d_v), jnp.float32)                  # bv
    est += 2 * _padded_bytes((1, d_model), jnp.float32)              # bo
    est += 2 * _padded_bytes((Bb, nq, d_model), io_dtype)            # output
    est += _padded_bytes((Bb * nq, d_model), jnp.float32)            # accumulator
    est += 2 * _padded_bytes((Bb * nq, d_k), jnp.float32)            # q slabs
    est += 4 * _padded_bytes((Bb * nk, max(d_k, d_v)), jnp.float32)  # k/v slabs
    est += 3 * _padded_bytes((Bb, nq, nk), jnp.float32)              # scores/probs
    vmem_limit = int(min(max(4 * est, 32 * 1024 * 1024), 64 * 1024 * 1024))

    kernel = _make_fused_kernel(d_k, d_v, mxu_dtype)

    return pl.pallas_call(
        kernel,
        out_shape=jax.ShapeDtypeStruct((b_s, nq, d_model), io_dtype),
        grid_spec=pltpu.PrefetchScalarGridSpec(
            num_scalar_prefetch=0,
            grid=(b_s // Bb, h),                       # (batch blocks, heads)
            in_specs=[
                # activations: resident across the head axis (index constant)
                pl.BlockSpec((Bb, nq, d_model), lambda b, hh: (b, 0, 0)),
                pl.BlockSpec((Bb, nk, d_model), lambda b, hh: (b, 0, 0)),
                pl.BlockSpec((Bb, nk, d_model), lambda b, hh: (b, 0, 0)),
                # per-head weight/bias slices via full-tile BlockSpec DMA
                pl.BlockSpec((None, d_model, d_k), lambda b, hh: (hh, 0, 0)),
                pl.BlockSpec((None, 1, d_k),       lambda b, hh: (hh, 0, 0)),
                pl.BlockSpec((None, d_model, d_k), lambda b, hh: (hh, 0, 0)),
                pl.BlockSpec((None, 1, d_k),       lambda b, hh: (hh, 0, 0)),
                pl.BlockSpec((None, d_model, d_v), lambda b, hh: (hh, 0, 0)),
                pl.BlockSpec((None, 1, d_v),       lambda b, hh: (hh, 0, 0)),
                pl.BlockSpec((None, d_v, d_model), lambda b, hh: (hh, 0, 0)),
                pl.BlockSpec((1, d_model),         lambda b, hh: (0, 0)),
            ],
            # Output block constant across the head axis -> accumulate over heads.
            out_specs=pl.BlockSpec((Bb, nq, d_model), lambda b, hh: (b, 0, 0)),
            scratch_shapes=[pltpu.VMEM((Bb * nq, d_model), jnp.float32)],
        ),
        compiler_params=pltpu.CompilerParams(
            dimension_semantics=("parallel", "arbitrary"),
            vmem_limit_bytes=vmem_limit,
        ),
    )(queries, keys, values, wq, bq, wk, bk, wv, bv, wo, bo)


# --------------------------------- module ----------------------------------- #
class ScaledDotProductAttentionPallas:
    def __init__(self, d_model, d_k, d_v, h, key, mxu_dtype=jnp.bfloat16):
        self.d_model, self.d_k, self.d_v, self.h = d_model, d_k, d_v, h
        self.mxu_dtype = mxu_dtype
        kq, kk, kv, ko = jax.random.split(key, 4)

        # PyTorch nn.Linear layout (d_out, d_in); init_weights(): std=0.001, bias=0.
        self.w_q_f32 = 0.001 * jax.random.normal(kq, (h * d_k, d_model), jnp.float32)
        self.b_q_f32 = jnp.zeros((h * d_k,), jnp.float32)
        self.w_k_f32 = 0.001 * jax.random.normal(kk, (h * d_k, d_model), jnp.float32)
        self.b_k_f32 = jnp.zeros((h * d_k,), jnp.float32)
        self.w_v_f32 = 0.001 * jax.random.normal(kv, (h * d_v, d_model), jnp.float32)
        self.b_v_f32 = jnp.zeros((h * d_v,), jnp.float32)
        self.w_o_f32 = 0.001 * jax.random.normal(ko, (d_model, h * d_v), jnp.float32)
        self.b_o_f32 = jnp.zeros((d_model,), jnp.float32)

        # Kernel-side parameters: per-head, pre-transposed (d_in, d_out) slabs so
        # every per-head slice is a full-tile BlockSpec DMA (no in-kernel slicing
        # or transposes); 1/sqrt(d_k) folded into the Q projection; matmul
        # operands stored in the MXU dtype, biases kept f32.
        inv_scale = 1.0 / math.sqrt(d_k)
        self.wq = (self.w_q_f32.reshape(h, d_k, d_model).transpose(0, 2, 1)
                   * inv_scale).astype(mxu_dtype)                       # (h, d_model, d_k)
        self.bq = (self.b_q_f32 * inv_scale).reshape(h, 1, d_k)
        self.wk = self.w_k_f32.reshape(h, d_k, d_model).transpose(0, 2, 1).astype(mxu_dtype)
        self.bk = self.b_k_f32.reshape(h, 1, d_k)
        self.wv = self.w_v_f32.reshape(h, d_v, d_model).transpose(0, 2, 1).astype(mxu_dtype)
        self.bv = self.b_v_f32.reshape(h, 1, d_v)
        self.wo = self.w_o_f32.T.reshape(h, d_v, d_model).astype(mxu_dtype)  # (h, d_v, d_model)
        self.bo = self.b_o_f32.reshape(1, d_model)

    def __call__(self, queries, keys, values):
        params = (self.wq, self.bq, self.wk, self.bk,
                  self.wv, self.bv, self.wo, self.bo)
        return fused_sdpa(queries, keys, values, params,
                          h=self.h, d_k=self.d_k, d_v=self.d_v,
                          mxu_dtype=self.mxu_dtype)


# --------------------------- pure-JAX reference ------------------------------ #
def reference_forward(mod, queries, keys, values):
    b_s, nq, _ = queries.shape
    nk = keys.shape[1]
    h, d_k, d_v = mod.h, mod.d_k, mod.d_v
    q = (queries @ mod.w_q_f32.T + mod.b_q_f32).reshape(b_s, nq, h, d_k).transpose(0, 2, 1, 3)
    k = (keys @ mod.w_k_f32.T + mod.b_k_f32).reshape(b_s, nk, h, d_k).transpose(0, 2, 3, 1)
    v = (values @ mod.w_v_f32.T + mod.b_v_f32).reshape(b_s, nk, h, d_v).transpose(0, 2, 1, 3)
    att = jnp.einsum("bhqd,bhdk->bhqk", q, k) / math.sqrt(d_k)
    att = jax.nn.softmax(att, axis=-1)
    out = jnp.einsum("bhqk,bhkd->bhqd", att, v)
    out = out.transpose(0, 2, 1, 3).reshape(b_s, nq, h * d_v)
    return out @ mod.w_o_f32.T + mod.b_o_f32


if __name__ == "__main__":
    b_s, nq, nk = 2, 8, 8
    d_model, d_k, d_v, h = 32, 16, 16, 4

    key = jax.random.PRNGKey(0)
    k_param, k_q, k_k, k_v = jax.random.split(key, 4)

    mod = ScaledDotProductAttentionPallas(d_model, d_k, d_v, h, k_param)

    queries = jax.random.normal(k_q, (b_s, nq, d_model), jnp.float32)
    keys = jax.random.normal(k_k, (b_s, nk, d_model), jnp.float32)
    values = jax.random.normal(k_v, (b_s, nk, d_model), jnp.float32)

    out = jax.block_until_ready(mod(queries, keys, values))
    assert out.shape == (b_s, nq, d_model)

    # Reference in full f32; kernel uses bf16 MXU operands with f32 accumulation
    # and an approx softmax reciprocal, so compare with a relative tolerance.
    ref = reference_forward(mod, queries, keys, values)
    err = float(jnp.max(jnp.abs(out - ref)))
    scale = float(jnp.max(jnp.abs(ref)))
    assert err <= 5e-2 * scale + 5e-6, f"mismatch vs reference: err={err} scale={scale}"

    print("KERNEL_OK")
</pallas_src>

<mosaic_0001>
module attributes {stable_mosaic.version = 11 : i64} {
  func.func @kernel(%arg0: i32, %arg1: i32, %arg2: memref<2x8x32xf32, #tpu.memory_space<vmem>>, %arg3: memref<2x8x32xf32, #tpu.memory_space<vmem>>, %arg4: memref<2x8x32xf32, #tpu.memory_space<vmem>>, %arg5: memref<1x32x16xbf16, #tpu.memory_space<vmem>>, %arg6: memref<1x1x16xf32, #tpu.memory_space<vmem>>, %arg7: memref<1x32x16xbf16, #tpu.memory_space<vmem>>, %arg8: memref<1x1x16xf32, #tpu.memory_space<vmem>>, %arg9: memref<1x32x16xbf16, #tpu.memory_space<vmem>>, %arg10: memref<1x1x16xf32, #tpu.memory_space<vmem>>, %arg11: memref<1x16x32xbf16, #tpu.memory_space<vmem>>, %arg12: memref<1x32xf32, #tpu.memory_space<vmem>>, %arg13: memref<2x8x32xf32, #tpu.memory_space<vmem>>, %arg14: memref<16x32xf32, #tpu.memory_space<vmem>>) attributes {dimension_semantics = [#tpu.dimension_semantics<parallel>, #tpu.dimension_semantics<arbitrary>], iteration_bounds = array<i64: 1, 4>, scalar_prefetch = 0 : i64, scratch_operands = 1 : i64, tpu.core_type = #tpu.core_type<tc>, window_params = [{transform_indices = @transform_0, window_bounds = array<i64: 2, 8, 32>}, {transform_indices = @transform_1, window_bounds = array<i64: 2, 8, 32>}, {transform_indices = @transform_2, window_bounds = array<i64: 2, 8, 32>}, {transform_indices = @transform_3, window_bounds = array<i64: 1, 32, 16>}, {transform_indices = @transform_4, window_bounds = array<i64: 1, 1, 16>}, {transform_indices = @transform_5, window_bounds = array<i64: 1, 32, 16>}, {transform_indices = @transform_6, window_bounds = array<i64: 1, 1, 16>}, {transform_indices = @transform_7, window_bounds = array<i64: 1, 32, 16>}, {transform_indices = @transform_8, window_bounds = array<i64: 1, 1, 16>}, {transform_indices = @transform_9, window_bounds = array<i64: 1, 16, 32>}, {pipeline_mode = #tpu.pipeline_mode<synchronous>, transform_indices = @transform_10, window_bounds = array<i64: 1, 32>}, {transform_indices = @transform_11, window_bounds = array<i64: 2, 8, 32>}]} {
    %c0_i32 = arith.constant 0 : i32
    %0 = arith.cmpi eq, %arg1, %c0_i32 : i32
    %1 = arith.extui %0 : i1 to i32
    %c0_i32_0 = arith.constant 0 : i32
    %2 = arith.cmpi ne, %1, %c0_i32_0 : i32
    scf.if %2 {
      %cst_42 = arith.constant 0.000000e+00 : f32
      %63 = vector.broadcast %cst_42 : f32 to vector<16x32xf32>
      %c0_43 = arith.constant 0 : index
      %c0_44 = arith.constant 0 : index
      %64 = vector.load %arg14[%c0_43, %c0_44] : memref<16x32xf32, #tpu.memory_space<vmem>>, vector<16x32xf32>
      tpu.vector_store %arg14[%c0_43, %c0_44], %63 {strides = array<i32>} : memref<16x32xf32, #tpu.memory_space<vmem>>, vector<16x32xf32>,
    } else {
    }
    %c0 = arith.constant 0 : index
    %c0_1 = arith.constant 0 : index
    %c0_2 = arith.constant 0 : index
    %3 = vector.load %arg2[%c0, %c0_1, %c0_2] : memref<2x8x32xf32, #tpu.memory_space<vmem>>, vector<2x8x32xf32>
    %4 = vector.shape_cast %3 : vector<2x8x32xf32> to vector<16x32xf32>
    %5 = arith.truncf %4 : vector<16x32xf32> to vector<16x32xbf16>
    %c0_3 = arith.constant 0 : index
    %c0_4 = arith.constant 0 : index
    %c0_5 = arith.constant 0 : index
    %6 = vector.load %arg3[%c0_3, %c0_4, %c0_5] : memref<2x8x32xf32, #tpu.memory_space<vmem>>, vector<2x8x32xf32>
    %7 = vector.shape_cast %6 : vector<2x8x32xf32> to vector<16x32xf32>
    %8 = arith.truncf %7 : vector<16x32xf32> to vector<16x32xbf16>
    %c0_6 = arith.constant 0 : index
    %c0_7 = arith.constant 0 : index
    %c0_8 = arith.constant 0 : index
    %9 = vector.load %arg4[%c0_6, %c0_7, %c0_8] : memref<2x8x32xf32, #tpu.memory_space<vmem>>, vector<2x8x32xf32>
    %10 = vector.shape_cast %9 : vector<2x8x32xf32> to vector<16x32xf32>
    %11 = arith.truncf %10 : vector<16x32xf32> to vector<16x32xbf16>
    %c0_9 = arith.constant 0 : index
    %c0_10 = arith.constant 0 : index
    %c0_11 = arith.constant 0 : index
    %12 = vector.load %arg5[%c0_9, %c0_10, %c0_11] : memref<1x32x16xbf16, #tpu.memory_space<vmem>>, vector<1x32x16xbf16>
    %13 = vector.shape_cast %12 : vector<1x32x16xbf16> to vector<32x16xbf16>
    %cst = arith.constant dense<0.000000e+00> : vector<16x16xf32>
    %14 = tpu.matmul %5, %13, %cst {dimension_numbers = #tpu.dot_dimension_numbers<[1], [0], [0], [1], [0, 0, 1, 1], [], []>} : vector<16x32xbf16>, vector<32x16xbf16>, vector<16x16xf32> -> vector<16x16xf32>
    %c0_12 = arith.constant 0 : index
    %c0_13 = arith.constant 0 : index
    %c0_14 = arith.constant 0 : index
    %15 = vector.load %arg6[%c0_12, %c0_13, %c0_14] : memref<1x1x16xf32, #tpu.memory_space<vmem>>, vector<1x1x16xf32>
    %16 = vector.shape_cast %15 : vector<1x1x16xf32> to vector<1x16xf32>
    %17 = vector.broadcast %16 : vector<1x16xf32> to vector<16x16xf32>
    %18 = arith.addf %14, %17 : vector<16x16xf32>
    %19 = arith.truncf %18 : vector<16x16xf32> to vector<16x16xbf16>
    %20 = vector.shape_cast %19 : vector<16x16xbf16> to vector<2x8x16xbf16>
    %c0_15 = arith.constant 0 : index
    %c0_16 = arith.constant 0 : index
    %c0_17 = arith.constant 0 : index
    %21 = vector.load %arg7[%c0_15, %c0_16, %c0_17] : memref<1x32x16xbf16, #tpu.memory_space<vmem>>, vector<1x32x16xbf16>
    %22 = vector.shape_cast %21 : vector<1x32x16xbf16> to vector<32x16xbf16>
    %cst_18 = arith.constant dense<0.000000e+00> : vector<16x16xf32>
    %23 = tpu.matmul %8, %22, %cst_18 {dimension_numbers = #tpu.dot_dimension_numbers<[1], [0], [0], [1], [0, 0, 1, 1], [], []>} : vector<16x32xbf16>, vector<32x16xbf16>, vector<16x16xf32> -> vector<16x16xf32>
    %c0_19 = arith.constant 0 : index
    %c0_20 = arith.constant 0 : index
    %c0_21 = arith.constant 0 : index
    %24 = vector.load %arg8[%c0_19, %c0_20, %c0_21] : memref<1x1x16xf32, #tpu.memory_space<vmem>>, vector<1x1x16xf32>
    %25 = vector.shape_cast %24 : vector<1x1x16xf32> to vector<1x16xf32>
    %26 = vector.broadcast %25 : vector<1x16xf32> to vector<16x16xf32>
    %27 = arith.addf %23, %26 : vector<16x16xf32>
    %28 = arith.truncf %27 : vector<16x16xf32> to vector<16x16xbf16>
    %29 = vector.shape_cast %28 : vector<16x16xbf16> to vector<2x8x16xbf16>
    %c0_22 = arith.constant 0 : index
    %c0_23 = arith.constant 0 : index
    %c0_24 = arith.constant 0 : index
    %30 = vector.load %arg9[%c0_22, %c0_23, %c0_24] : memref<1x32x16xbf16, #tpu.memory_space<vmem>>, vector<1x32x16xbf16>
    %31 = vector.shape_cast %30 : vector<1x32x16xbf16> to vector<32x16xbf16>
    %cst_25 = arith.constant dense<0.000000e+00> : vector<16x16xf32>
    %32 = tpu.matmul %11, %31, %cst_25 {dimension_numbers = #tpu.dot_dimension_numbers<[1], [0], [0], [1], [0, 0, 1, 1], [], []>} : vector<16x32xbf16>, vector<32x16xbf16>, vector<16x16xf32> -> vector<16x16xf32>
    %c0_26 = arith.constant 0 : index
    %c0_27 = arith.constant 0 : index
    %c0_28 = arith.constant 0 : index
    %33 = vector.load %arg10[%c0_26, %c0_27, %c0_28] : memref<1x1x16xf32, #tpu.memory_space<vmem>>, vector<1x1x16xf32>
    %34 = vector.shape_cast %33 : vector<1x1x16xf32> to vector<1x16xf32>
    %35 = vector.broadcast %34 : vector<1x16xf32> to vector<16x16xf32>
    %36 = arith.addf %32, %35 : vector<16x16xf32>
    %37 = arith.truncf %36 : vector<16x16xf32> to vector<16x16xbf16>
    %38 = vector.shape_cast %37 : vector<16x16xbf16> to vector<2x8x16xbf16>
    "tpu.trace_start"() <{level = 10 : i32, message = "bqd,bkd->bqk"}> : () -> ()
    %cst_29 = arith.constant dense<0.000000e+00> : vector<2x8x8xf32>
    %39 = tpu.matmul %20, %29, %cst_29 {dimension_numbers = #tpu.dot_dimension_numbers<[2], [2], [1], [1], [0, 0, 0, 1, 1, 1], [0], [0]>} : vector<2x8x16xbf16>, vector<2x8x16xbf16>, vector<2x8x8xf32> -> vector<2x8x8xf32>
    "tpu.trace_stop"() : () -> ()
    %cst_30 = arith.constant dense<0xFF800000> : vector<2x8xf32>
    %40 = vector.multi_reduction <maximumf>, %39, %cst_30 [2] : vector<2x8x8xf32> to vector<2x8xf32>
    %41 = vector.shape_cast %40 : vector<2x8xf32> to vector<2x8x1xf32>
    %42 = vector.broadcast %41 : vector<2x8x1xf32> to vector<2x8x8xf32>
    %43 = arith.subf %39, %42 : vector<2x8x8xf32>
    %44 = math.exp %43 : vector<2x8x8xf32>
    %cst_31 = arith.constant dense<0.000000e+00> : vector<2x8xf32>
    %45 = vector.multi_reduction <add>, %44, %cst_31 [2] : vector<2x8x8xf32> to vector<2x8xf32>
    %46 = vector.shape_cast %45 : vector<2x8xf32> to vector<2x8x1xf32>
    %47 = tpu.reciprocal %46 {approx = true} : vector<2x8x1xf32> -> vector<2x8x1xf32>
    %48 = vector.broadcast %47 : vector<2x8x1xf32> to vector<2x8x8xf32>
    %49 = arith.mulf %44, %48 : vector<2x8x8xf32>
    %50 = arith.truncf %49 : vector<2x8x8xf32> to vector<2x8x8xbf16>
    "tpu.trace_start"() <{level = 10 : i32, message = "bqk,bkd->bqd"}> : () -> ()
    %cst_32 = arith.constant dense<0.000000e+00> : vector<2x8x16xf32>
    %51 = tpu.matmul %50, %38, %cst_32 {dimension_numbers = #tpu.dot_dimension_numbers<[2], [1], [1], [2], [0, 0, 0, 1, 1, 2], [0], [0]>} : vector<2x8x8xbf16>, vector<2x8x16xbf16>, vector<2x8x16xf32> -> vector<2x8x16xf32>
    "tpu.trace_stop"() : () -> ()
    %c0_33 = arith.constant 0 : index
    %c0_34 = arith.constant 0 : index
    %52 = vector.load %arg14[%c0_33, %c0_34] : memref<16x32xf32, #tpu.memory_space<vmem>>, vector<16x32xf32>
    %53 = vector.shape_cast %51 : vector<2x8x16xf32> to vector<16x16xf32>
    %54 = arith.truncf %53 : vector<16x16xf32> to vector<16x16xbf16>
    %c0_35 = arith.constant 0 : index
    %c0_36 = arith.constant 0 : index
    %c0_37 = arith.constant 0 : index
    %55 = vector.load %arg11[%c0_35, %c0_36, %c0_37] : memref<1x16x32xbf16, #tpu.memory_space<vmem>>, vector<1x16x32xbf16>
    %56 = vector.shape_cast %55 : vector<1x16x32xbf16> to vector<16x32xbf16>
    %cst_38 = arith.constant dense<0.000000e+00> : vector<16x32xf32>
    %57 = tpu.matmul %54, %56, %cst_38 {dimension_numbers = #tpu.dot_dimension_numbers<[1], [0], [0], [1], [0, 0, 1, 1], [], []>} : vector<16x16xbf16>, vector<16x32xbf16>, vector<16x32xf32> -> vector<16x32xf32>
    %58 = arith.addf %52, %57 : vector<16x32xf32>
    %c0_39 = arith.constant 0 : index
    %c0_40 = arith.constant 0 : index
    %59 = vector.load %arg14[%c0_39, %c0_40] : memref<16x32xf32, #tpu.memory_space<vmem>>, vector<16x32xf32>
    tpu.vector_store %arg14[%c0_39, %c0_40], %58 {strides = array<i32>} : memref<16x32xf32, #tpu.memory_space<vmem>>, vector<16x32xf32>,
    %c3_i32 = arith.constant 3 : i32
    %60 = arith.cmpi eq, %arg1, %c3_i32 : i32
    %61 = arith.extui %60 : i1 to i32
    %c0_i32_41 = arith.constant 0 : i32
    %62 = arith.cmpi ne, %61, %c0_i32_41 : i32
    scf.if %62 {
      %c0_42 = arith.constant 0 : index
      %c0_43 = arith.constant 0 : index
      %63 = vector.load %arg14[%c0_42, %c0_43] : memref<16x32xf32, #tpu.memory_space<vmem>>, vector<16x32xf32>
      %c0_44 = arith.constant 0 : index
      %c0_45 = arith.constant 0 : index
      %64 = vector.load %arg12[%c0_44, %c0_45] : memref<1x32xf32, #tpu.memory_space<vmem>>, vector<1x32xf32>
      %65 = vector.broadcast %64 : vector<1x32xf32> to vector<16x32xf32>
      %66 = arith.addf %63, %65 : vector<16x32xf32>
      %67 = vector.shape_cast %66 : vector<16x32xf32> to vector<2x8x32xf32>
      %c0_46 = arith.constant 0 : index
      %c0_47 = arith.constant 0 : index
      %c0_48 = arith.constant 0 : index
      %68 = vector.load %arg13[%c0_46, %c0_47, %c0_48] : memref<2x8x32xf32, #tpu.memory_space<vmem>>, vector<2x8x32xf32>
      tpu.vector_store %arg13[%c0_46, %c0_47, %c0_48], %67 {strides = array<i32>} : memref<2x8x32xf32, #tpu.memory_space<vmem>>, vector<2x8x32xf32>,
    } else {
    }
    return
  }
  func.func @transform_0(%arg0: i32, %arg1: i32) -> (i32, i32, i32) {
    %c0_i32 = arith.constant 0 : i32
    %c0_i32_0 = arith.constant 0 : i32
    %c0_i32_1 = arith.constant 0 : i32
    return %arg0, %c0_i32, %c0_i32_0 : i32, i32, i32
  }
  func.func @transform_1(%arg0: i32, %arg1: i32) -> (i32, i32, i32) {
    %c0_i32 = arith.constant 0 : i32
    %c0_i32_0 = arith.constant 0 : i32
    %c0_i32_1 = arith.constant 0 : i32
    return %arg0, %c0_i32, %c0_i32_0 : i32, i32, i32
  }
  func.func @transform_2(%arg0: i32, %arg1: i32) -> (i32, i32, i32) {
    %c0_i32 = arith.constant 0 : i32
    %c0_i32_0 = arith.constant 0 : i32
    %c0_i32_1 = arith.constant 0 : i32
    return %arg0, %c0_i32, %c0_i32_0 : i32, i32, i32
  }
  func.func @transform_3(%arg0: i32, %arg1: i32) -> (i32, i32, i32) {
    %c0_i32 = arith.constant 0 : i32
    %c0_i32_0 = arith.constant 0 : i32
    %c0_i32_1 = arith.constant 0 : i32
    return %arg1, %c0_i32, %c0_i32_0 : i32, i32, i32
  }
  func.func @transform_4(%arg0: i32, %arg1: i32) -> (i32, i32, i32) {
    %c0_i32 = arith.constant 0 : i32
    %c0_i32_0 = arith.constant 0 : i32
    %c0_i32_1 = arith.constant 0 : i32
    return %arg1, %c0_i32, %c0_i32_0 : i32, i32, i32
  }
  func.func @transform_5(%arg0: i32, %arg1: i32) -> (i32, i32, i32) {
    %c0_i32 = arith.constant 0 : i32
    %c0_i32_0 = arith.constant 0 : i32
    %c0_i32_1 = arith.constant 0 : i32
    return %arg1, %c0_i32, %c0_i32_0 : i32, i32, i32
  }
  func.func @transform_6(%arg0: i32, %arg1: i32) -> (i32, i32, i32) {
    %c0_i32 = arith.constant 0 : i32
    %c0_i32_0 = arith.constant 0 : i32
    %c0_i32_1 = arith.constant 0 : i32
    return %arg1, %c0_i32, %c0_i32_0 : i32, i32, i32
  }
  func.func @transform_7(%arg0: i32, %arg1: i32) -> (i32, i32, i32) {
    %c0_i32 = arith.constant 0 : i32
    %c0_i32_0 = arith.constant 0 : i32
    %c0_i32_1 = arith.constant 0 : i32
    return %arg1, %c0_i32, %c0_i32_0 : i32, i32, i32
  }
  func.func @transform_8(%arg0: i32, %arg1: i32) -> (i32, i32, i32) {
    %c0_i32 = arith.constant 0 : i32
    %c0_i32_0 = arith.constant 0 : i32
    %c0_i32_1 = arith.constant 0 : i32
    return %arg1, %c0_i32, %c0_i32_0 : i32, i32, i32
  }
  func.func @transform_9(%arg0: i32, %arg1: i32) -> (i32, i32, i32) {
    %c0_i32 = arith.constant 0 : i32
    %c0_i32_0 = arith.constant 0 : i32
    %c0_i32_1 = arith.constant 0 : i32
    return %arg1, %c0_i32, %c0_i32_0 : i32, i32, i32
  }
  func.func @transform_10(%arg0: i32, %arg1: i32) -> (i32, i32) {
    %c0_i32 = arith.constant 0 : i32
    %c0_i32_0 = arith.constant 0 : i32
    %c0_i32_1 = arith.constant 0 : i32
    return %c0_i32, %c0_i32_0 : i32, i32
  }
  func.func @transform_11(%arg0: i32, %arg1: i32) -> (i32, i32, i32) {
    %c0_i32 = arith.constant 0 : i32
    %c0_i32_0 = arith.constant 0 : i32
    %c0_i32_1 = arith.constant 0 : i32
    return %arg0, %c0_i32, %c0_i32_0 : i32, i32, i32
  }
}

</mosaic_0001>

<bundles_post_ra>
// kernel: tpu_custom_call.1
= control target key start
LH: loop header
LB: loop body
LE: loop exit
PB: predicated region body
PF: predicated region fallthrough
CT: control target
= control target key end

     0   :  { %s1731_s0 = inlined_call_operand.vmem [shape: f32[2,8,32], index: 0, kind: input, shape index: {}]   ;;  %s1732_s1 = inlined_call_operand.vmem [shape: f32[2,8,32], index: 1, kind: input, shape index: {}]   ;;  %s1733_s2 = inlined_call_operand.vmem [shape: f32[2,8,32], index: 2, kind: input, shape index: {}]   ;;  %s1734_s3 = inlined_call_operand.vmem [shape: bf16[4,32,16], index: 3, kind: input, shape index: {}]   ;;  %s1735_s4 = inlined_call_operand.vmem [shape: f32[4,1,16], index: 4, kind: input, shape index: {}]   ;;  %s1736_s5 = inlined_call_operand.vmem [shape: bf16[4,32,16], index: 5, kind: input, shape index: {}]   ;;  %s1737_s6 = inlined_call_operand.vmem [shape: f32[4,1,16], index: 6, kind: input, shape index: {}]   ;;  %s1738_s7 = inlined_call_operand.vmem [shape: bf16[4,32,16], index: 7, kind: input, shape index: {}]   ;;  %s1739_s8 = inlined_call_operand.vmem [shape: f32[4,1,16], index: 8, kind: input, shape index: {}]   ;;  %s1740_s9 = inlined_call_operand.vmem [shape: bf16[4,16,32], index: 9, kind: input, shape index: {}]   ;;  %s1741_s10 = inlined_call_operand.vmem [shape: f32[1,32], index: 10, kind: input, shape index: {}]   ;;  %s1742_s11 = inlined_call_operand.hbm [shape: f32[2,8,32], index: 11, kind: output, shape index: {}]  }
   0x1   :  { %1745 = sst [smem:[#allocation8_spill]] %s1734_s3 }
   0x2   :  { %1746 = sst [smem:[#allocation9_spill]] %s1742_s11 }
   0x3   :  { %16 = vsyncpa [#allocation4], 0  ;;  %s1553_s17 = smov 0   ;;  %s1555_s18 = smov 0  }
   0x4   :  { %s1557_s19 = smov 0  }
   0x5 LB: > { %1747 = sst [smem:[#allocation6_spill]] %s1481_s18  ;;  %s31_s21 = sadd.s32 1, %s1481_s18  ;;  %s1485_s19 = sphi %s1557_s19, %s22_s19   ;;  %s1481_s18 = sphi %s1555_s18, %s1755_s18   ;;  %s1477_s17 = sphi %s1553_s17, %s1754_s17  }
   0x6   : > { %p32_p0 = scmp.ge.s32.totalorder %s31_s21, 4  ;;  %p1259_p1 = scmp.ge.s32.totalorder %s1485_s19, 1 }
   0x7   : > { %p437_p2 = scmp.lt.s32.totalorder %s1485_s19, 5 }
   0x8   : > { %s1757_s21 = smov (%p32_p0, %s31_s21), 0 }
   0x9   : > { %1748 = sst [smem:[#allocation7_spill]] %s1757_s21  ;;  %p438_p3 = pnand %p1259_p1, %p437_p2 }
   0xa   : > { %p529_p4 = scmp.lt.s32.totalorder (!%p438_p3), %s1477_s17, 3  ;;  %s1749_s3 = sld [smem:[#allocation8_spill]] (!%p438_p3) }
   0xb   : > { %441 = sbr.rel (%p438_p3) target bundleno = 1264 (0x4f0), region = 64  ;;  %p1268_p5 = scmp.ne.s32.totalorder (!%p438_p3), %s1477_s17, 0 }
  0x12   : > { %s1576_s22 = scalar_select %p529_p4, %s1477_s17, 3 }
  0x13   : > { %563 = sbr.rel (%p1268_p5) target bundleno = 26 (0x1a), region = 68  ;;  %vm564_vm0 = vcmask (!%p1268_p5), 261120   ;;  %v1487_v0 = vmov (!%p1268_p5), 0.0  }
  0x14   : > { %s1299_s23 = sshll.u32 %s1576_s22, 4  ;;  %s544_s16 = scalar_lea.vmem %s1737_s6, %s1576_s22  ;;  %565 = vst.msk [vmem:[#allocation2] sm:$0xff] (!%p1268_p5), %vm564_vm0, %v1487_v0  ;;  %566 = vst.msk [vmem:[#allocation2 + $0x8] sm:$0xff] (!%p1268_p5), %vm564_vm0, %v1487_v0 }
  0x15   : > { %s533_s29 = scalar_lea.vmem %s1749_s3, %s1299_s23  ;;  %s541_s13 = scalar_lea.vmem %s1736_s5, %s1299_s23 }
  0x16   : > { %s1596_s18 = scalar_lea.vmem %s1738_s7, %s1299_s23  ;;  %s552_s25 = scalar_lea.vmem %s1739_s8, %s1576_s22 }
  0x17   : > { %s1302_s26 = sshll.u32 %s1576_s22, 3 }
  0x18   : > { %s1606_s3 = scalar_lea.vmem %s1740_s9, %s1302_s26 }
  0x1a PF: > { %v1418_v1 = vld [vmem:[%s541_s13] sm:$0xff]   ;;  %v1488_v2 = vmov 0.0   ;;  %v1419_v3 = vld [vmem:[%s541_s13 + $0x8] sm:$0xff]   ;;  %vm1489_vm1 = vmmov 0   ;;  %vm599_vm2 = vcmask 261120   ;;  %vm796_vm3 = vcmask 130048   ;;  %s1750_s20 = scalar_lea.vmem %s1735_s4, %s1576_s22 }
  0x1b   : > { %1336 = vmatprep.subr.bf16.mxu1 %v1488_v2  ;;  %1328 = vmatprep.subr.bf16.mxu0 %v1488_v2  ;;  %v1420_v4 = vld [vmem:[%s533_s29] sm:$0xff]   ;;  %v571_v6 = vld [vmem:[%s1732_s1 + $0x8] sm:$0xff]  ;;  %vm917_vm4 = vcmask 1043456   ;;  %vm889_vm5 = vcmask 64512   ;;  %p1293_p6 = scmp.ne.s32.totalorder %s1477_s17, 3 }
  0x1c   : > { %1337 = vmatpush3.bf16.msra.mxu1 %v1418_v1  ;;  %1340 = vmatprep.mubr.msk.bf16.mxu1 %vm1489_vm1, %v1488_v2  ;;  %v570_v5 = vld [vmem:[%s1732_s1] sm:$0xff]  ;;  %v1421_v7 = vld [vmem:[%s533_s29 + $0x8] sm:$0xff]  }
  0x1d   : > { %1338 = vmatprep.subr.bf16.mxu1 %v1488_v2  ;;  %1332 = vmatprep.mubr.msk.bf16.mxu0 %vm1489_vm1, %v1488_v2  ;;  %v567_v8 = vld [vmem:[%s1731_s0] sm:$0xff]  ;;  %v572_v9 = vpack.c.bf16 %v571_v6, %v570_v5  ;;  %v568_v10 = vld [vmem:[%s1731_s0 + $0x8] sm:$0xff] }
  0x1e   : > { %1329 = vmatpush3.bf16.msra.mxu0 %v1420_v4  ;;  %v569_v11 = vpack.c.bf16 %v568_v10, %v567_v8  ;;  %v1422_v12 = vld [vmem:[%s1596_s18] sm:$0xff]   ;;  %v1423_v13 = vld [vmem:[%s1596_s18 + $0x8] sm:$0xff]  }
  0x1f   : > { %1330 = vmatprep.subr.bf16.mxu0 %v1488_v2  ;;  %v573_v14 = vld [vmem:[%s1733_s2] sm:$0xff]  ;;  %v574_v15 = vld [vmem:[%s1733_s2 + $0x8] sm:$0xff] }
  0x20   : > { %1339 = vmatpush3.bf16.msra.mxu1 %v1419_v3  ;;  %v575_v16 = vpack.c.bf16 %v574_v15, %v573_v14  ;;  %v1275_v17 = vld [vmem:[%s544_s16] ss:$0 sm:$0xff] }
  0x21   : > { %1352 = vmatprep.subr.bf16.mxu1 %v1488_v2  ;;  %v1269_v22 = vld [vmem:[%s1750_s20] ss:$0 sm:$0xff] }
  0x22   : > { %1331 = vmatpush3.bf16.msra.mxu0 %v1421_v7  ;;  %v1281_v37 = vld [vmem:[%s552_s25] ss:$0 sm:$0xff] }
  0x23   : > { %1341 = vmatmul.mubr.msk.bf16.vlgmr.msra.gmra.mrb[0].mxu1 %vm599_vm2, %v572_v9  ;;  %1344 = vmatprep.subr.bf16.mxu0 %v1488_v2 }
  0x24   : > { %1354 = vmatprep.mubr.msk.bf16.mxu1 %vm1489_vm1, %v1488_v2 }
  0x25   : > { %1333 = vmatmul.mubr.msk.bf16.vlgmr.msra.gmra.mrb[0].mxu0 %vm599_vm2, %v569_v11 }
  0x26   : > { %1345 = vmatpush3.bf16.msra.mxu0 %v1422_v12  ;;  %1348 = vmatprep.mubr.msk.bf16.mxu0 %vm1489_vm1, %v1488_v2 }
  0x27   : > { %1346 = vmatprep.subr.bf16.mxu0 %v1488_v2 }
  0x2a   : > { %1347 = vmatpush3.bf16.msra.mxu0 %v1423_v13  ;;  %v1424_v13 = vld [vmem:[%s1606_s3] sm:$0xff]  }
  0x2b   : > { %1358 = vmatprep.subr.bf16.mxu0 %v1488_v2 }
  0x2d   : > { %1349 = vmatmul.mubr.msk.bf16.vlgmr.msra.gmra.mrb[4].mxu0 %vm599_vm2, %v575_v16 }
  0x2e   : > { %1360 = vmatprep.mubr.msk.bf16.mxu0 %vm1489_vm1, %v1488_v2 }
  0xf6   : > { %v710_v18 = vpop.f32.mrb[0].mxu1 }
  0xf7   : > { %v711_v19 = vadd.f32 %v1275_v17, %v710_v18  ;;  %v1342_v20 = vpop.f32.mrb[1].mxu1 }
  0xf8   : > { %v713_v21 = vpop.f32.mrb[2].mxu1  ;;  %v637_v23 = vpop.f32.mrb[0].mxu0 }
  0xf9   : > { %v1305_v24 = vpack.c.bf16 %v711_v19, %v711_v19  ;;  %v714_v25 = vadd.f32 %v1275_v17, %v713_v21  ;;  %v1343_v26 = vpop.f32.mrb[3].mxu1  ;;  %v1334_v27 = vpop.f32.mrb[1].mxu0  ;;  %v638_v31 = vadd.f32 %v1269_v22, %v637_v23  ;;  %v1007_v23 = vld [vmem:[#allocation2] sm:$0xff] }
  0xfa   : > { %v640_v28 = vpop.f32.mrb[2].mxu0 }
  0xfb   : > { %v801_v29 = vsel %vm796_vm3, %v1305_v24, 0  ;;  %v1306_v30 = vpack.c.bf16 %v714_v25, %v714_v25  ;;  %v1335_v32 = vpop.f32.mrb[3].mxu0  ;;  %v1303_v34 = vpack.c.bf16 %v638_v31, %v638_v31  ;;  %v641_v35 = vadd.f32 %v1269_v22, %v640_v28  ;;  %v1008_v25 = vld [vmem:[#allocation2 + $0x8] sm:$0xff]  ;;  %v1294_v31 = vld [vmem:[%s1741_s10] ss:$0 sm:$0xff] (!%p1293_p6) }
  0xfc   : > { %1353 = vmatpush3.bf16.xpose.msra.mxu1 %v801_v29 }
  0xfd   : > { %v847_v33 = vsel %vm796_vm3, %v1306_v30, 0  ;;  %1364 = vmatprep.subr.bf16.mxu1 %v1488_v2  ;;  %v1304_v36 = vpack.c.bf16 %v641_v35, %v641_v35 }
  0xfe   : > { %1359 = vmatpush3.bf16.xpose.msra.mxu0 %v847_v33 }
  0xff   : > { %1370 = vmatprep.subr.bf16.mxu0 %v1488_v2 }
 0x100   : > { %v783_v38 = vpop.f32.mrb[4].mxu0 }
 0x101   : > { %v784_v39 = vadd.f32 %v1281_v37, %v783_v38  ;;  %v1350_v40 = vpop.f32.mrb[5].mxu0 }
 0x102   : > { %v786_v41 = vpop.f32.mrb[6].mxu0 }
 0x103   : > { %1355 = vmatmul.mubr.msk.bf16.vlgmr.msra.gmra.mrb[4].mxu1 %vm796_vm3, %v1303_v34  ;;  %v1307_v42 = vpack.c.bf16 %v784_v39, %v784_v39  ;;  %v787_v43 = vadd.f32 %v1281_v37, %v786_v41  ;;  %v1351_v44 = vpop.f32.mrb[7].mxu0 }
 0x104   : > { %1366 = vmatprep.mubr.msk.bf16.mxu1 %vm1489_vm1, %v1488_v2 }
 0x105   : > { %1361 = vmatmul.mubr.msk.bf16.vlgmr.msra.gmra.mrb[8].mxu0 %vm796_vm3, %v1304_v36  ;;  %v919_v45 = vsel %vm917_vm4, %v1307_v42, 0  ;;  %v1308_v46 = vpack.c.bf16 %v787_v43, %v787_v43 }
 0x106   : > { %1372 = vmatprep.mubr.msk.bf16.mxu0 %vm1489_vm1, %v1488_v2  ;;  %1365 = vmatpush3.bf16.msra.mxu1 %v919_v45 }
 0x107   : > { %v965_v47 = vsel %vm917_vm4, %v1308_v46, 0  ;;  %1376 = vmatprep.subr.bf16.mxu1 %v1488_v2 }
 0x108   : > { %1371 = vmatpush3.bf16.msra.mxu0 %v965_v47 }
 0x1d6   : > { %v837_v48 = vpop.f32.mrb[4].mxu1 }
 0x1d7   : > { %v1356_v49 = vpop.f32.mrb[5].mxu1  ;;  %v890_v50 = vsel %vm889_vm5, %v837_v48, -inf }
 0x1d8   : > { %891 = vmax.xlane.f32.xlu0 %v890_v50  ;;  %v840_v51 = vpop.f32.mrb[6].mxu1  ;;  %v883_v52 = vpop.f32.mrb[8].mxu0 }
 0x1d9   : > { %v1357_v53 = vpop.f32.mrb[7].mxu1  ;;  %v1362_v54 = vpop.f32.mrb[9].mxu0  ;;  %v893_v57 = vsel %vm889_vm5, %v883_v52, -inf }
 0x1da   : > { %v886_v55 = vpop.f32.mrb[10].mxu0 }
 0x1db   : > { %v1363_v56 = vpop.f32.mrb[11].mxu0 }
 0x1dc   : > { %894 = vmax.xlane.f32.xlu0 %v893_v57 }
 0x265   : > { %v892_v58 = vpop.xlane.xlu0 %891 }
 0x266   : > { %v896_v59 = vsub.f32 %v837_v48, %v892_v58 }
 0x268   : > { %v898_v60 = vmul.f32 1.442695, %v896_v59 }
 0x269   : > { %v895_v61 = vpop.xlane.xlu0 %894 }
 0x26a   : > { %1425 = vpow2.f32 %v898_v60  ;;  %v897_v62 = vsub.f32 %v883_v52, %v895_v61 }
 0x26c   : > { %v900_v63 = vmul.f32 1.442695, %v897_v62 }
 0x26e   : > { %1427 = vpow2.f32 %v900_v63 }
 0x274   : > { %v1426_v0 = vpop.eup %1425 }
 0x275   : > { %v902_v1 = vsel %vm889_vm5, %v1426_v0, 0.0 }
 0x276   : > { %903 = vadd.xlane.f32.xlu1 %v902_v1 }
 0x278   : > { %v1428_v3 = vpop.eup %1427 }
 0x279   : > { %v905_v4 = vsel %vm889_vm5, %v1428_v3, 0.0 }
 0x27a   : > { %906 = vadd.xlane.f32.xlu1 %v905_v4 }
 0x303   : > { %v904_v5 = vpop.xlane.xlu1 %903 }
 0x304   : > { %1429 = vrcp.f32 %v904_v5 }
 0x307   : > { %v907_v6 = vpop.xlane.xlu1 %906 }
 0x308   : > { %1431 = vrcp.f32 %v907_v6 }
 0x30e   : > { %v1430_v7 = vpop.eup %1429 }
 0x30f   : > { %v910_v8 = vmul.f32 %v1430_v7, %v1426_v0 }
 0x311   : > { %v912_v9 = vpack.c.bf16 %v910_v8, %v910_v8 }
 0x312   : > { %v1432_v10 = vpop.eup %1431 }
 0x313   : > { %v911_v11 = vmul.f32 %v1432_v10, %v1428_v3  ;;  %1367 = vmatmul.mubr.msk.bf16.vlgmr.msra.gmra.mrb[8].mxu1 %vm889_vm5, %v912_v9 }
 0x314   : > { %1378 = vmatprep.mubr.msk.bf16.mxu1 %vm1489_vm1, %v1488_v2  ;;  %1377 = vmatpush3.bf16.msra.mxu1 %v1424_v13 }
 0x315   : > { %v913_v12 = vpack.c.bf16 %v911_v11, %v911_v11 }
 0x317   : > { %1373 = vmatmul.mubr.msk.bf16.vlgmr.msra.gmra.mrb[12].mxu0 %vm889_vm5, %v913_v12 }
 0x3e6   : > { %v955_v14 = vpop.f32.mrb[8].mxu1 }
 0x3e7   : > { %v1368_v15 = vpop.f32.mrb[9].mxu1 }
 0x3e8   : > { %v958_v16 = vpop.f32.mrb[10].mxu1 }
 0x3e9   : > { %v1369_v17 = vpop.f32.mrb[11].mxu1 }
 0x3ea   : > { %v1001_v18 = vpop.f32.mrb[12].mxu0 }
 0x3eb   : > { %v1009_v19 = vpack.c.bf16 %v1001_v18, %v955_v14  ;;  %v1374_v20 = vpop.f32.mrb[13].mxu0 }
 0x3ec   : > { %v1004_v21 = vpop.f32.mrb[14].mxu0 }
 0x3ed   : > { %v1375_v22 = vpop.f32.mrb[15].mxu0  ;;  %1379 = vmatmul.mubr.msk.bf16.vlgmr.msra.gmra.mrb[12].mxu1 %vm796_vm3, %v1009_v19 }
 0x4bf   : > { %1069 = sbr.rel (%p1293_p6) target bundleno = 1232 (0x4d0), region = 72 }
 0x4c0   : > { %v1055_v24 = vpop.f32.mrb[12].mxu1 }
 0x4c1   : > { %v1062_v2 = vadd.f32 %v1055_v24, %v1007_v23  ;;  %v1380_v26 = vpop.f32.mrb[13].mxu1 }
 0x4c2   : > { %v1058_v27 = vpop.f32.mrb[14].mxu1 }
 0x4c3   : > { %1064 = vst.msk [vmem:[#allocation2] sm:$0xff] %vm599_vm2, %v1062_v2  ;;  %v1063_v28 = vadd.f32 %v1058_v27, %v1008_v25  ;;  %v1381_v29 = vpop.f32.mrb[15].mxu1 }
 0x4c5   : > { %1065 = vst.msk [vmem:[#allocation2 + $0x8] sm:$0xff] %vm599_vm2, %v1063_v28 }
 0x4ca   : > { %v1070_v30 = vld [vmem:[#allocation2] sm:$0xff] }
 0x4cb   : > { %v1079_v33 = vadd.f32 %v1294_v31, %v1070_v30 }
 0x4cc   : > { %v1071_v32 = vld [vmem:[#allocation2 + $0x8] sm:$0xff] }
 0x4cd   : > { %v1080_v34 = vadd.f32 %v1294_v31, %v1071_v32  ;;  %1081 = vst.msk [vmem:[#allocation3] sm:$0xff] %vm599_vm2, %v1079_v33 }
 0x4cf   : > { %1082 = vst.msk [vmem:[#allocation3 + $0x8] sm:$0xff] %vm599_vm2, %v1080_v34 }
 0x4d0 PF: > { %s1751_s25 = sadd.s32 4294967295, %s1485_s19   ;;  %s1490_s17 = smov [#allocation3]  }
 0x4d1   : > { %p1696_p7 = scmp.eq.s32.totalorder %s1751_s25, 3  ;;  %s1092_s26 = sshll.u32 %s1490_s17, 4  ;;  %s1093_s26 = int_to_ptr.vmem [resolvable:$true] %s1092_s26 }
 0x4d2   : > { %s1433_s30 = scalar_lea.vmem %s1093_s26, 256  ;;  %p1440_p11 = scmp.lt.s32.totalorder %s1093_s26, %s1093_s26 }
 0x4d3   : > { %p1434_p8 = scmp.ne.s32.totalorder %s1093_s26, %s1433_s30  ;;  %p1441_p12 = scmp.lt.s32.totalorder %s1433_s30, %s1433_s30 }
 0x4d5   : > { %p1435_p9 = pnand %p1434_p8, %p1696_p7  ;;  %p1442_p13 = por %p1441_p12, %p1440_p11 }
 0x4d7   : > { %p1436_p10 = pneg %p1435_p9 }
 0x4d9   : > { %p1443_p0 = pnand %p1442_p13, %p1436_p10 }
 0x4db   : > { %1446 = shalt.err (!%p1443_p0)
}
 0x4dc   : > { %s1753_s29 = sld [smem:[#allocation9_spill]] }
 0x4e2   : > { %s1447_s14 = scalar_lea.hbm %s1753_s29, 256 }
 0x4e3   : > { %p1448_p1 = scmp.ne.s32.totalorder %s1753_s29, %s1447_s14  ;;  %p1453_p4 = scmp.lt.u32.totalorder %s1447_s14, %s1753_s29 }
 0x4e5   : > { %p1449_p2 = pnand %p1448_p1, %p1696_p7 }
 0x4e7   : > { %p1450_p3 = pneg %p1449_p2 }
 0x4e9   : > { %p1455_p5 = pnand %p1453_p4, %p1450_p3 }
 0x4eb   : > { %1458 = shalt.err (!%p1455_p5)
}
 0x4ec   : > { %s1491_s28 = smov 128   ;;  %s1492_s11 = smov 8  }
 0x4ed   : > { %1383 = dma.vmem_to_hbm [thread:$0]  (%p1696_p7), %s1093_s26, 256, %s1753_s29, [#allocation4], %s1491_s28, %s1491_s28, %s1492_s11  }
 0x4ee   : > { %1472 = dma.done.wait (%p1696_p7), [#allocation4], 256  }
 0x4ef   : > { %1474 = vsyncadd (%p1696_p7), [#allocation4], 4294967040 }
 0x4f0 PF: > { %s22_s19 = sadd.s32 1, %s1485_s19   ;;  %s1754_s17 = sld [smem:[#allocation6_spill]] }
 0x4f1   : > { %p19_p6 = scmp.ge.s32.totalorder %s22_s19, 6   ;;  %s1755_s18 = sld [smem:[#allocation7_spill]] }
 0x4f3   :  { %21 = sbr.rel (!%p19_p6) target bundleno = 5 (0x5), region = 127 }
 0x4fa   :  { %1108 = vsyncpa [#allocation4], 1 }
 0x4fb   :  { %1110 = vsyncpa [#allocation4 + $0x1], 1 }

</bundles_post_ra>
